<compile_context>
chip_gen: v7x
topology: tpu7x:2x2x1
jax: 0.10.0
libtpu: 0.0.40
codegen_flags: <defaults>
</compile_context>

<pallas_src>
import functools
import math

import jax
import jax.numpy as jnp
from jax.experimental import pallas as pl
from jax.experimental.pallas import tpu as pltpu


def _inr_kernel(x_ref, w1_ref, b1_ref, wh_ref, bh_ref, wo_ref, bo_ref, o_ref,
                *, in_dim: int, hidden: int, n_hidden: int):
    """Fused SIREN MLP on one lane-tile of rows (features on sublanes).

    x_ref : (in_dim, tr)               transposed input coordinates
    w1_ref: (hidden, in_dim)           first Siren weight, pre-scaled by w0
    b1_ref: (hidden, 1)                first Siren bias,   pre-scaled by w0
    wh_ref: (n_hidden, hidden, hidden) hidden Siren weights, pre-scaled by w0
    bh_ref: (n_hidden, hidden, 1)      hidden Siren biases,  pre-scaled by w0
    wo_ref: (out_ch, hidden)           final Linear weight
    bo_ref: (out_ch, 1)                final Linear bias
    o_ref : (out_ch, tr)               transposed output
    """
    x = x_ref[...].astype(jnp.float32)

    # ---- first Siren layer: in_dim broadcast-MACs on the VPU --------------------
    w1 = w1_ref[...]
    acc = w1[:, 0:1] * x[0:1, :]
    for k in range(1, in_dim):                           # static, tiny unroll
        acc = acc + w1[:, k:k + 1] * x[k:k + 1, :]
    h = jnp.sin(acc + b1_ref[...])                       # (hidden, tr)

    # ---- hidden Siren layers: `hidden` broadcast-MACs each ----------------------
    for l in range(n_hidden):                            # static unroll
        wl = wh_ref[l]                                   # (hidden, hidden)
        acc = wl[:, 0:1] * h[0:1, :]
        for k in range(1, hidden):
            acc = acc + wl[:, k:k + 1] * h[k:k + 1, :]
        h = jnp.sin(acc + bh_ref[l])

    # ---- final Linear + 0.5: lane-dense (out_ch, tr) output ---------------------
    wo = wo_ref[...]
    out = wo[:, 0:1] * h[0:1, :]
    for k in range(1, hidden):
        out = out + wo[:, k:k + 1] * h[k:k + 1, :]
    out = out + bo_ref[...] + 0.5
    o_ref[...] = out.astype(o_ref.dtype)


def _pack_params(params, w0):
    """params: list of (weight, bias) in PyTorch layout (dim_out, dim_in)/(dim_out,).

    w0 is folded into every Siren weight/bias so the kernel computes sin(z).
    """
    assert len(params) >= 3, "expect at least one hidden Siren layer (n_layers >= 3)"
    (w1, b1), mids, (wo, bo) = params[0], params[1:-1], params[-1]
    f32 = jnp.float32
    w1p = (w0 * w1).astype(f32)                                # (hidden, in_dim)
    b1p = (w0 * b1).astype(f32)[:, None]                       # (hidden, 1)
    whp = jnp.stack([(w0 * w).astype(f32) for w, _ in mids])   # (n_hid, hidden, hidden)
    bhp = jnp.stack([(w0 * b).astype(f32)[:, None] for _, b in mids])  # (n_hid, hidden, 1)
    wop = wo.astype(f32)                                       # (out_ch, hidden)
    bop = bo.astype(f32)[:, None]                              # (out_ch, 1)
    return w1p, b1p, whp, bhp, wop, bop


def inr_forward(x, params, *, w0=30.0, tile_rows=8192):
    assert jnp.issubdtype(x.dtype, jnp.floating), "INR expects floating-point coords"
    *lead, in_dim = x.shape
    assert in_dim == params[0][0].shape[1]
    hidden = params[0][0].shape[0]
    out_channels = params[-1][0].shape[0]
    n_hidden = len(params) - 2

    n = math.prod(lead) if lead else 1
    # One cheap XLA transpose -> (in_dim, N): contiguous, full-lane input DMA.
    xt = x.reshape(n, in_dim).T

    w1p, b1p, whp, bhp, wop, bop = _pack_params(params, float(w0))

    # Row tile: multiple of 128 lanes; shrink so the grid has >= 2 steps whenever
    # possible (megacore on v7x); ragged last block handled by Pallas.
    tr = max(128, min(tile_rows, pl.cdiv(pl.cdiv(n, 2), 128) * 128))
    grid = (pl.cdiv(n, tr),)

    kernel = functools.partial(_inr_kernel, in_dim=in_dim, hidden=hidden,
                               n_hidden=n_hidden)

    out_t = pl.pallas_call(
        kernel,
        out_shape=jax.ShapeDtypeStruct((out_channels, n), x.dtype),
        grid=grid,
        in_specs=[
            pl.BlockSpec((in_dim, tr), lambda i: (0, i)),   # lane-dense x tile
            pl.BlockSpec(w1p.shape, lambda i: (0, 0)),      # weights: constant block
            pl.BlockSpec(b1p.shape, lambda i: (0, 0)),      # index -> VMEM-resident,
            pl.BlockSpec(whp.shape, lambda i: (0, 0, 0)),   # fetched once, no re-DMA
            pl.BlockSpec(bhp.shape, lambda i: (0, 0, 0)),
            pl.BlockSpec(wop.shape, lambda i: (0, 0)),
            pl.BlockSpec(bop.shape, lambda i: (0, 0)),
        ],
        out_specs=pl.BlockSpec((out_channels, tr), lambda i: (0, i)),
        compiler_params=pltpu.CompilerParams(
            dimension_semantics=("parallel",),
        ),
    )(xt, w1p, b1p, whp, bhp, wop, bop)

    # (out_ch, N) -> (..., out_ch); for out_ch == 1 this is a free reshape.
    return out_t.T.reshape(tuple(lead) + (out_channels,))


def init_inr_params(key, *, in_dim=2, n_layers=3, up_scale=4, out_channels=1,
                    w0=30.0, c=6.0):
    """Mirrors the PyTorch INR/Siren initialization (pe_features=None path)."""
    hidden = in_dim * up_scale
    keys = jax.random.split(key, n_layers + 1)
    params = []
    # first Siren: uniform(-1/dim_in, 1/dim_in), zero bias
    w_std = 1.0 / in_dim
    params.append((
        jax.random.uniform(keys[0], (hidden, in_dim), jnp.float32, -w_std, w_std),
        jnp.zeros((hidden,), jnp.float32),
    ))
    # hidden Sirens: uniform(+-sqrt(c/dim)/w0), zero bias
    for i in range(n_layers - 2):
        w_std = math.sqrt(c / hidden) / w0
        params.append((
            jax.random.uniform(keys[1 + i], (hidden, hidden), jnp.float32, -w_std, w_std),
            jnp.zeros((hidden,), jnp.float32),
        ))
    # final nn.Linear: PyTorch default uniform(+-1/sqrt(fan_in))
    bound = 1.0 / math.sqrt(hidden)
    params.append((
        jax.random.uniform(keys[n_layers - 1], (out_channels, hidden), jnp.float32,
                           -bound, bound),
        jax.random.uniform(keys[n_layers], (out_channels,), jnp.float32, -bound, bound),
    ))
    return params


def inr_reference(x, params, *, w0=30.0):
    """Pure-JAX reference matching the PyTorch INR forward."""
    h = x.astype(jnp.float32)
    hp = jax.lax.Precision.HIGHEST
    for w, b in params[:-1]:
        h = jnp.sin(w0 * (jnp.dot(h, w.T, precision=hp) + b))
    w, b = params[-1]
    return (jnp.dot(h, w.T, precision=hp) + b + 0.5).astype(x.dtype)


if __name__ == "__main__":
    key = jax.random.PRNGKey(0)
    k_x, k_p = jax.random.split(key)

    # Batch of 2 coordinate grids, 16x16 spatial, 2-D coordinates (INR in_dim=2).
    B, Hs, Ws, in_dim = 2, 16, 16, 2
    x = jax.random.uniform(k_x, (B, Hs, Ws, in_dim), jnp.float32,
                           minval=-1.0, maxval=1.0)

    w0 = 30.0  # Siren default inside INR
    params = init_inr_params(k_p, in_dim=in_dim, n_layers=3, up_scale=4,
                             out_channels=1, w0=w0)

    y = inr_forward(x, params, w0=w0)
    jax.block_until_ready(y)

    y_ref = inr_reference(x.reshape(-1, in_dim), params, w0=w0).reshape(B, Hs, Ws, 1)
    assert y.shape == (B, Hs, Ws, 1) and y.dtype == x.dtype
    max_err = float(jnp.max(jnp.abs(y - y_ref)))
    assert max_err < 1e-2, f"max abs err {max_err}"
    print("KERNEL_OK")
</pallas_src>

<mosaic_0001>
module attributes {stable_mosaic.version = 11 : i64} {
  func.func @_inr_kernel(%arg0: i32, %arg1: memref<2x256xf32, #tpu.memory_space<vmem>>, %arg2: memref<8x2xf32, #tpu.memory_space<vmem>>, %arg3: memref<8x1xf32, #tpu.memory_space<vmem>>, %arg4: memref<1x8x8xf32, #tpu.memory_space<vmem>>, %arg5: memref<1x8x1xf32, #tpu.memory_space<vmem>>, %arg6: memref<1x8xf32, #tpu.memory_space<vmem>>, %arg7: memref<1x1xf32, #tpu.memory_space<vmem>>, %arg8: memref<1x256xf32, #tpu.memory_space<vmem>>) attributes {dimension_semantics = [#tpu.dimension_semantics<parallel>], iteration_bounds = array<i64: 2>, scalar_prefetch = 0 : i64, scratch_operands = 0 : i64, tpu.core_type = #tpu.core_type<tc>, window_params = [{transform_indices = @transform_0, window_bounds = array<i64: 2, 256>}, {pipeline_mode = #tpu.pipeline_mode<synchronous>, transform_indices = @transform_1, window_bounds = array<i64: 8, 2>}, {pipeline_mode = #tpu.pipeline_mode<synchronous>, transform_indices = @transform_2, window_bounds = array<i64: 8, 1>}, {pipeline_mode = #tpu.pipeline_mode<synchronous>, transform_indices = @transform_3, window_bounds = array<i64: 1, 8, 8>}, {pipeline_mode = #tpu.pipeline_mode<synchronous>, transform_indices = @transform_4, window_bounds = array<i64: 1, 8, 1>}, {pipeline_mode = #tpu.pipeline_mode<synchronous>, transform_indices = @transform_5, window_bounds = array<i64: 1, 8>}, {pipeline_mode = #tpu.pipeline_mode<synchronous>, transform_indices = @transform_6, window_bounds = array<i64: 1, 1>}, {transform_indices = @transform_7, window_bounds = array<i64: 1, 256>}]} {
    %c0 = arith.constant 0 : index
    %c0_0 = arith.constant 0 : index
    %0 = vector.load %arg1[%c0, %c0_0] : memref<2x256xf32, #tpu.memory_space<vmem>>, vector<2x256xf32>
    %c0_1 = arith.constant 0 : index
    %c0_2 = arith.constant 0 : index
    %1 = vector.load %arg2[%c0_1, %c0_2] : memref<8x2xf32, #tpu.memory_space<vmem>>, vector<8x2xf32>
    %2 = vector.extract_strided_slice %1 {offsets = [0, 0], sizes = [8, 1], strides = [1, 1]} : vector<8x2xf32> to vector<8x1xf32>
    %3 = vector.extract_strided_slice %0 {offsets = [0, 0], sizes = [1, 256], strides = [1, 1]} : vector<2x256xf32> to vector<1x256xf32>
    %4 = vector.broadcast %2 : vector<8x1xf32> to vector<8x256xf32>
    %5 = vector.broadcast %3 : vector<1x256xf32> to vector<8x256xf32>
    %6 = arith.mulf %4, %5 : vector<8x256xf32>
    %7 = vector.extract_strided_slice %1 {offsets = [0, 1], sizes = [8, 1], strides = [1, 1]} : vector<8x2xf32> to vector<8x1xf32>
    %8 = vector.extract_strided_slice %0 {offsets = [1, 0], sizes = [1, 256], strides = [1, 1]} : vector<2x256xf32> to vector<1x256xf32>
    %9 = vector.broadcast %7 : vector<8x1xf32> to vector<8x256xf32>
    %10 = vector.broadcast %8 : vector<1x256xf32> to vector<8x256xf32>
    %11 = arith.mulf %9, %10 : vector<8x256xf32>
    %12 = arith.addf %6, %11 : vector<8x256xf32>
    %c0_3 = arith.constant 0 : index
    %c0_4 = arith.constant 0 : index
    %13 = vector.load %arg3[%c0_3, %c0_4] : memref<8x1xf32, #tpu.memory_space<vmem>>, vector<8x1xf32>
    %14 = vector.broadcast %13 : vector<8x1xf32> to vector<8x256xf32>
    %15 = arith.addf %12, %14 : vector<8x256xf32>
    %16 = math.sin %15 : vector<8x256xf32>
    %c0_5 = arith.constant 0 : index
    %c0_6 = arith.constant 0 : index
    %c0_7 = arith.constant 0 : index
    %17 = vector.load %arg4[%c0_5, %c0_6, %c0_7] : memref<1x8x8xf32, #tpu.memory_space<vmem>>, vector<1x8x8xf32>
    %18 = vector.shape_cast %17 : vector<1x8x8xf32> to vector<8x8xf32>
    %19 = vector.extract_strided_slice %18 {offsets = [0, 0], sizes = [8, 1], strides = [1, 1]} : vector<8x8xf32> to vector<8x1xf32>
    %20 = vector.extract_strided_slice %16 {offsets = [0, 0], sizes = [1, 256], strides = [1, 1]} : vector<8x256xf32> to vector<1x256xf32>
    %21 = vector.broadcast %19 : vector<8x1xf32> to vector<8x256xf32>
    %22 = vector.broadcast %20 : vector<1x256xf32> to vector<8x256xf32>
    %23 = arith.mulf %21, %22 : vector<8x256xf32>
    %24 = vector.extract_strided_slice %18 {offsets = [0, 1], sizes = [8, 1], strides = [1, 1]} : vector<8x8xf32> to vector<8x1xf32>
    %25 = vector.extract_strided_slice %16 {offsets = [1, 0], sizes = [1, 256], strides = [1, 1]} : vector<8x256xf32> to vector<1x256xf32>
    %26 = vector.broadcast %24 : vector<8x1xf32> to vector<8x256xf32>
    %27 = vector.broadcast %25 : vector<1x256xf32> to vector<8x256xf32>
    %28 = arith.mulf %26, %27 : vector<8x256xf32>
    %29 = arith.addf %23, %28 : vector<8x256xf32>
    %30 = vector.extract_strided_slice %18 {offsets = [0, 2], sizes = [8, 1], strides = [1, 1]} : vector<8x8xf32> to vector<8x1xf32>
    %31 = vector.extract_strided_slice %16 {offsets = [2, 0], sizes = [1, 256], strides = [1, 1]} : vector<8x256xf32> to vector<1x256xf32>
    %32 = vector.broadcast %30 : vector<8x1xf32> to vector<8x256xf32>
    %33 = vector.broadcast %31 : vector<1x256xf32> to vector<8x256xf32>
    %34 = arith.mulf %32, %33 : vector<8x256xf32>
    %35 = arith.addf %29, %34 : vector<8x256xf32>
    %36 = vector.extract_strided_slice %18 {offsets = [0, 3], sizes = [8, 1], strides = [1, 1]} : vector<8x8xf32> to vector<8x1xf32>
    %37 = vector.extract_strided_slice %16 {offsets = [3, 0], sizes = [1, 256], strides = [1, 1]} : vector<8x256xf32> to vector<1x256xf32>
    %38 = vector.broadcast %36 : vector<8x1xf32> to vector<8x256xf32>
    %39 = vector.broadcast %37 : vector<1x256xf32> to vector<8x256xf32>
    %40 = arith.mulf %38, %39 : vector<8x256xf32>
    %41 = arith.addf %35, %40 : vector<8x256xf32>
    %42 = vector.extract_strided_slice %18 {offsets = [0, 4], sizes = [8, 1], strides = [1, 1]} : vector<8x8xf32> to vector<8x1xf32>
    %43 = vector.extract_strided_slice %16 {offsets = [4, 0], sizes = [1, 256], strides = [1, 1]} : vector<8x256xf32> to vector<1x256xf32>
    %44 = vector.broadcast %42 : vector<8x1xf32> to vector<8x256xf32>
    %45 = vector.broadcast %43 : vector<1x256xf32> to vector<8x256xf32>
    %46 = arith.mulf %44, %45 : vector<8x256xf32>
    %47 = arith.addf %41, %46 : vector<8x256xf32>
    %48 = vector.extract_strided_slice %18 {offsets = [0, 5], sizes = [8, 1], strides = [1, 1]} : vector<8x8xf32> to vector<8x1xf32>
    %49 = vector.extract_strided_slice %16 {offsets = [5, 0], sizes = [1, 256], strides = [1, 1]} : vector<8x256xf32> to vector<1x256xf32>
    %50 = vector.broadcast %48 : vector<8x1xf32> to vector<8x256xf32>
    %51 = vector.broadcast %49 : vector<1x256xf32> to vector<8x256xf32>
    %52 = arith.mulf %50, %51 : vector<8x256xf32>
    %53 = arith.addf %47, %52 : vector<8x256xf32>
    %54 = vector.extract_strided_slice %18 {offsets = [0, 6], sizes = [8, 1], strides = [1, 1]} : vector<8x8xf32> to vector<8x1xf32>
    %55 = vector.extract_strided_slice %16 {offsets = [6, 0], sizes = [1, 256], strides = [1, 1]} : vector<8x256xf32> to vector<1x256xf32>
    %56 = vector.broadcast %54 : vector<8x1xf32> to vector<8x256xf32>
    %57 = vector.broadcast %55 : vector<1x256xf32> to vector<8x256xf32>
    %58 = arith.mulf %56, %57 : vector<8x256xf32>
    %59 = arith.addf %53, %58 : vector<8x256xf32>
    %60 = vector.extract_strided_slice %18 {offsets = [0, 7], sizes = [8, 1], strides = [1, 1]} : vector<8x8xf32> to vector<8x1xf32>
    %61 = vector.extract_strided_slice %16 {offsets = [7, 0], sizes = [1, 256], strides = [1, 1]} : vector<8x256xf32> to vector<1x256xf32>
    %62 = vector.broadcast %60 : vector<8x1xf32> to vector<8x256xf32>
    %63 = vector.broadcast %61 : vector<1x256xf32> to vector<8x256xf32>
    %64 = arith.mulf %62, %63 : vector<8x256xf32>
    %65 = arith.addf %59, %64 : vector<8x256xf32>
    %c0_8 = arith.constant 0 : index
    %c0_9 = arith.constant 0 : index
    %c0_10 = arith.constant 0 : index
    %66 = vector.load %arg5[%c0_8, %c0_9, %c0_10] : memref<1x8x1xf32, #tpu.memory_space<vmem>>, vector<1x8x1xf32>
    %67 = vector.shape_cast %66 : vector<1x8x1xf32> to vector<8x1xf32>
    %68 = vector.broadcast %67 : vector<8x1xf32> to vector<8x256xf32>
    %69 = arith.addf %65, %68 : vector<8x256xf32>
    %70 = math.sin %69 : vector<8x256xf32>
    %c0_11 = arith.constant 0 : index
    %c0_12 = arith.constant 0 : index
    %71 = vector.load %arg6[%c0_11, %c0_12] : memref<1x8xf32, #tpu.memory_space<vmem>>, vector<1x8xf32>
    %72 = vector.extract_strided_slice %71 {offsets = [0, 0], sizes = [1, 1], strides = [1, 1]} : vector<1x8xf32> to vector<1x1xf32>
    %73 = vector.extract_strided_slice %70 {offsets = [0, 0], sizes = [1, 256], strides = [1, 1]} : vector<8x256xf32> to vector<1x256xf32>
    %74 = vector.broadcast %72 : vector<1x1xf32> to vector<1x256xf32>
    %75 = arith.mulf %74, %73 : vector<1x256xf32>
    %76 = vector.extract_strided_slice %71 {offsets = [0, 1], sizes = [1, 1], strides = [1, 1]} : vector<1x8xf32> to vector<1x1xf32>
    %77 = vector.extract_strided_slice %70 {offsets = [1, 0], sizes = [1, 256], strides = [1, 1]} : vector<8x256xf32> to vector<1x256xf32>
    %78 = vector.broadcast %76 : vector<1x1xf32> to vector<1x256xf32>
    %79 = arith.mulf %78, %77 : vector<1x256xf32>
    %80 = arith.addf %75, %79 : vector<1x256xf32>
    %81 = vector.extract_strided_slice %71 {offsets = [0, 2], sizes = [1, 1], strides = [1, 1]} : vector<1x8xf32> to vector<1x1xf32>
    %82 = vector.extract_strided_slice %70 {offsets = [2, 0], sizes = [1, 256], strides = [1, 1]} : vector<8x256xf32> to vector<1x256xf32>
    %83 = vector.broadcast %81 : vector<1x1xf32> to vector<1x256xf32>
    %84 = arith.mulf %83, %82 : vector<1x256xf32>
    %85 = arith.addf %80, %84 : vector<1x256xf32>
    %86 = vector.extract_strided_slice %71 {offsets = [0, 3], sizes = [1, 1], strides = [1, 1]} : vector<1x8xf32> to vector<1x1xf32>
    %87 = vector.extract_strided_slice %70 {offsets = [3, 0], sizes = [1, 256], strides = [1, 1]} : vector<8x256xf32> to vector<1x256xf32>
    %88 = vector.broadcast %86 : vector<1x1xf32> to vector<1x256xf32>
    %89 = arith.mulf %88, %87 : vector<1x256xf32>
    %90 = arith.addf %85, %89 : vector<1x256xf32>
    %91 = vector.extract_strided_slice %71 {offsets = [0, 4], sizes = [1, 1], strides = [1, 1]} : vector<1x8xf32> to vector<1x1xf32>
    %92 = vector.extract_strided_slice %70 {offsets = [4, 0], sizes = [1, 256], strides = [1, 1]} : vector<8x256xf32> to vector<1x256xf32>
    %93 = vector.broadcast %91 : vector<1x1xf32> to vector<1x256xf32>
    %94 = arith.mulf %93, %92 : vector<1x256xf32>
    %95 = arith.addf %90, %94 : vector<1x256xf32>
    %96 = vector.extract_strided_slice %71 {offsets = [0, 5], sizes = [1, 1], strides = [1, 1]} : vector<1x8xf32> to vector<1x1xf32>
    %97 = vector.extract_strided_slice %70 {offsets = [5, 0], sizes = [1, 256], strides = [1, 1]} : vector<8x256xf32> to vector<1x256xf32>
    %98 = vector.broadcast %96 : vector<1x1xf32> to vector<1x256xf32>
    %99 = arith.mulf %98, %97 : vector<1x256xf32>
    %100 = arith.addf %95, %99 : vector<1x256xf32>
    %101 = vector.extract_strided_slice %71 {offsets = [0, 6], sizes = [1, 1], strides = [1, 1]} : vector<1x8xf32> to vector<1x1xf32>
    %102 = vector.extract_strided_slice %70 {offsets = [6, 0], sizes = [1, 256], strides = [1, 1]} : vector<8x256xf32> to vector<1x256xf32>
    %103 = vector.broadcast %101 : vector<1x1xf32> to vector<1x256xf32>
    %104 = arith.mulf %103, %102 : vector<1x256xf32>
    %105 = arith.addf %100, %104 : vector<1x256xf32>
    %106 = vector.extract_strided_slice %71 {offsets = [0, 7], sizes = [1, 1], strides = [1, 1]} : vector<1x8xf32> to vector<1x1xf32>
    %107 = vector.extract_strided_slice %70 {offsets = [7, 0], sizes = [1, 256], strides = [1, 1]} : vector<8x256xf32> to vector<1x256xf32>
    %108 = vector.broadcast %106 : vector<1x1xf32> to vector<1x256xf32>
    %109 = arith.mulf %108, %107 : vector<1x256xf32>
    %110 = arith.addf %105, %109 : vector<1x256xf32>
    %c0_13 = arith.constant 0 : index
    %c0_14 = arith.constant 0 : index
    %111 = vector.load %arg7[%c0_13, %c0_14] : memref<1x1xf32, #tpu.memory_space<vmem>>, vector<1x1xf32>
    %112 = vector.broadcast %111 : vector<1x1xf32> to vector<1x256xf32>
    %113 = arith.addf %110, %112 : vector<1x256xf32>
    %cst = arith.constant 5.000000e-01 : f32
    %114 = vector.broadcast %cst : f32 to vector<1x256xf32>
    %115 = arith.addf %113, %114 : vector<1x256xf32>
    %c0_15 = arith.constant 0 : index
    %c0_16 = arith.constant 0 : index
    %116 = vector.load %arg8[%c0_15, %c0_16] : memref<1x256xf32, #tpu.memory_space<vmem>>, vector<1x256xf32>
    tpu.vector_store %arg8[%c0_15, %c0_16], %115 {strides = array<i32>} : memref<1x256xf32, #tpu.memory_space<vmem>>, vector<1x256xf32>,
    return
  }
  func.func @transform_0(%arg0: i32) -> (i32, i32) {
    %c0_i32 = arith.constant 0 : i32
    %c0_i32_0 = arith.constant 0 : i32
    return %c0_i32, %arg0 : i32, i32
  }
  func.func @transform_1(%arg0: i32) -> (i32, i32) {
    %c0_i32 = arith.constant 0 : i32
    %c0_i32_0 = arith.constant 0 : i32
    %c0_i32_1 = arith.constant 0 : i32
    return %c0_i32, %c0_i32_0 : i32, i32
  }
  func.func @transform_2(%arg0: i32) -> (i32, i32) {
    %c0_i32 = arith.constant 0 : i32
    %c0_i32_0 = arith.constant 0 : i32
    %c0_i32_1 = arith.constant 0 : i32
    return %c0_i32, %c0_i32_0 : i32, i32
  }
  func.func @transform_3(%arg0: i32) -> (i32, i32, i32) {
    %c0_i32 = arith.constant 0 : i32
    %c0_i32_0 = arith.constant 0 : i32
    %c0_i32_1 = arith.constant 0 : i32
    %c0_i32_2 = arith.constant 0 : i32
    return %c0_i32, %c0_i32_0, %c0_i32_1 : i32, i32, i32
  }
  func.func @transform_4(%arg0: i32) -> (i32, i32, i32) {
    %c0_i32 = arith.constant 0 : i32
    %c0_i32_0 = arith.constant 0 : i32
    %c0_i32_1 = arith.constant 0 : i32
    %c0_i32_2 = arith.constant 0 : i32
    return %c0_i32, %c0_i32_0, %c0_i32_1 : i32, i32, i32
  }
  func.func @transform_5(%arg0: i32) -> (i32, i32) {
    %c0_i32 = arith.constant 0 : i32
    %c0_i32_0 = arith.constant 0 : i32
    %c0_i32_1 = arith.constant 0 : i32
    return %c0_i32, %c0_i32_0 : i32, i32
  }
  func.func @transform_6(%arg0: i32) -> (i32, i32) {
    %c0_i32 = arith.constant 0 : i32
    %c0_i32_0 = arith.constant 0 : i32
    %c0_i32_1 = arith.constant 0 : i32
    return %c0_i32, %c0_i32_0 : i32, i32
  }
  func.func @transform_7(%arg0: i32) -> (i32, i32) {
    %c0_i32 = arith.constant 0 : i32
    %c0_i32_0 = arith.constant 0 : i32
    return %c0_i32, %arg0 : i32, i32
  }
}

</mosaic_0001>

<bundles_post_ra>
// kernel: tpu_custom_call.1
= control target key start
LH: loop header
LB: loop body
LE: loop exit
PB: predicated region body
PF: predicated region fallthrough
CT: control target
= control target key end

     0   :  { %s1751_s0 = inlined_call_operand.vmem [shape: f32[2,512], index: 0, kind: input, shape index: {}]   ;;  %s1752_s1 = inlined_call_operand.vmem [shape: f32[8,2], index: 1, kind: input, shape index: {}]   ;;  %s1753_s2 = inlined_call_operand.vmem [shape: f32[8,1], index: 2, kind: input, shape index: {}]   ;;  %s1754_s3 = inlined_call_operand.vmem [shape: f32[1,8,8], index: 3, kind: input, shape index: {}]   ;;  %s1755_s4 = inlined_call_operand.vmem [shape: f32[1,8,1], index: 4, kind: input, shape index: {}]   ;;  %s1756_s5 = inlined_call_operand.vmem [shape: f32[1,8], index: 5, kind: input, shape index: {}]   ;;  %s1757_s6 = inlined_call_operand.<no memory space> [shape: f32[1,1], index: 6, kind: input, shape index: {}]   ;;  %s1758_s7 = inlined_call_operand.hbm [shape: f32[1,512], index: 7, kind: output, shape index: {}]  }
   0x1   :  { %v12_v0 = vstv %s1757_s6 }
   0x2   :  { %13 = vst [vmem:[#allocation2] sm:$0x1] %v12_v0 }
   0x3   :  { %14 = vsyncpa [#allocation4], 0 }
   0x4   :  { %16 = vsyncpa [#allocation4 + $0x1], 0  ;;  %s1403_s26 = smov 0   ;;  %s1405_s27 = smov 0  }
   0x5   :  { %s1407_s28 = smov 0   ;;  %s1409_s29 = smov 0  }
   0x6 LB: > { %s1424_s6 = sadd.s32 4294967295, %s1342_s29   ;;  %s1145_s30 = sadd.s32 4294967294, %s1342_s29   ;;  %s1342_s29 = sphi %s1409_s29, %s1768_s29   ;;  %s1338_s28 = sphi %s1407_s28, %s1767_s28   ;;  %s1334_s27 = sphi %s1405_s27, %s1766_s27   ;;  %s1330_s26 = sphi %s1403_s26, %s1765_s26  }
   0x7   : > { %s1428_s8 = sadd.s32 1, %s1342_s29   ;;  %s181_s9 = sadd.s32 1, %s1338_s28 }
   0x8   : > { %s178_s10 = ssub.s32 %s1342_s29, %s1428_s8  ;;  %p191_p0 = scmp.ne.s32.totalorder %s1338_s28, %s1334_s27 }
   0x9   : > { %p179_p1 = scmp.eq.s32.totalorder %s178_s10, 0  ;;  %p192_p2 = scmp.eq.s32.totalorder %s1424_s6, 1 }
   0xa   : > { %p197_p3 = scmp.ne.s32.totalorder %s1334_s27, %s1330_s26  ;;  %p198_p4 = scmp.eq.s32.totalorder %s1145_s30, 1 }
   0xb   : > { %s1439_s11 = scalar_select %p179_p1, %s1338_s28, %s181_s9  }
   0xc   : > { %p1441_p5 = por %p192_p2, %p191_p0  ;;  %p1445_p6 = por %p198_p4, %p197_p3 }
   0xd   : > { %p1148_p7 = scmp.ge.s32.totalorder %s1342_s29, 1  ;;  %p243_p8 = scmp.lt.s32.totalorder %s1342_s29, 3 }
   0xf   : > { %p244_p9 = pnand %p1148_p7, %p243_p8 }
  0x10   : > { %v283_v1 = vld [vmem:[%s1752_s1] sm:$0xff] (!%p244_p9)  ;;  %v1344_v3 = vmov (!%p244_p9), 0   ;;  %v1345_v5 = vmov (!%p244_p9), 1   ;;  %v1346_v6 = vmov (!%p244_p9), 2   ;;  %v1347_v7 = vmov (!%p244_p9), 3   ;;  %s1150_s24 = sshll.u32 (!%p244_p9), %s1424_s6, 1 }
  0x11   : > { %247 = sbr.rel (%p244_p9) target bundleno = 392 (0x188), region = 48  ;;  %v336_v2 = vld [vmem:[%s1753_s2] sm:$0xff] (!%p244_p9)  ;;  %1244 = vset.pattern.permute.xlu0 (!%p244_p9), %v1344_v3  ;;  %1246 = vset.pattern.permute.xlu1 (!%p244_p9), %v1344_v3  ;;  %v1348_v8 = vmov (!%p244_p9), 5   ;;  %v1349_v10 = vmov (!%p244_p9), 4   ;;  %v1350_v11 = vmov (!%p244_p9), 6   ;;  %v1351_v12 = vmov (!%p244_p9), 7  }
  0x12   : > { %286 = vperm.xlu0 (!%p244_p9), %1244, %v283_v1   ;;  %339 = vperm.xlu1 (!%p244_p9), %1246, %v336_v2   ;;  %v552_v4 = vld [vmem:[%s1754_s3] sm:$0xff] (!%p244_p9)  ;;  %p276_p10 = scmp.lt.s32.totalorder (!%p244_p9), %s1150_s24, 3  ;;  %v290_v15 = vlaneseq (!%p244_p9)  ;;  %v1352_v61 = vmov (!%p244_p9), 683565275   ;;  %s272_s14 = sand.u32 (!%p244_p9), 1, %s1334_s27  }
  0x13   : > { %v680_v9 = vld [vmem:[%s1755_s4] sm:$0xff] (!%p244_p9)  ;;  %s1149_s15 = sshll.u32 (!%p244_p9), %s272_s14, 1  ;;  %s1173_s16 = sshll.u32 (!%p244_p9), %s1424_s6, 5 }
  0x14   : > { %v896_v13 = vld [vmem:[%s1756_s5] sm:$0x1] (!%p244_p9)  ;;  %v1468_v16 = vshrl.u32 (!%p244_p9), %v290_v15, 7  ;;  %s274_s17 = scalar_lea.vmem (!%p244_p9), [#allocation3], %s1149_s15  ;;  %s1709_s21 = scalar_lea.hbm (!%p244_p9), %s1758_s7, %s1173_s16 }
  0x15   : > { %v1034_v14 = vld [vmem:[#allocation2] sm:$0x1] (!%p244_p9)  ;;  %s1086_s18 = sshll.u32 (!%p244_p9), %s274_s17, 4  ;;  %s1072_s22 = scalar_lea.sflag (!%p244_p9), [#allocation4], %s272_s14  ;;  %s1711_s18 = int_to_ptr.vmem [resolvable:$true] %s1086_s18 }
  0x16   : > { %1245 = vset.pattern.permute.xlu0 (!%p244_p9), %v1345_v5  ;;  %555 = vperm.xlu1 (!%p244_p9), %1246, %v552_v4   ;;  %v1474_v17 = vsub.s32 (!%p244_p9), 0, %v1468_v16  ;;  %v1477_v18 = vsub.s32 (!%p244_p9), 2, %v1468_v16  ;;  %v1480_v19 = vsub.s32 (!%p244_p9), 1, %v1468_v16  ;;  %v1483_v20 = vsub.s32 (!%p244_p9), 3, %v1468_v16  ;;  %s1280_s23 = scalar_lea.vmem (!%p244_p9), %s1711_s18, 32  ;;  %s1359_s6 = smov (!%p244_p9), [#allocation3]  }
  0x17   : > { %311 = vperm.xlu0 (!%p244_p9), %1245, %v283_v1   ;;  %v1353_v1 = vmov (!%p244_p9), 2475754826   ;;  %p1281_p11 = scmp.ne.s32.totalorder (!%p244_p9), %s1711_s18, %s1280_s23 }
  0x18   : > { %s1770_s24 = smov (!%p276_p10, %s1150_s24), 3 }
  0x19   : > { %s1151_s25 = sshll.u32 %s1770_s24, 1  ;;  %p1282_p12 = pnand %p1281_p11, %p1441_p5 }
  0x1a   : > { %1247 = vset.pattern.permute.xlu1 %v1345_v5  ;;  %s279_s10 = scalar_lea.vmem %s1751_s0, %s1151_s25  ;;  %s1284_s24 = sshll.u32 %s1359_s6, 4  ;;  %s1285_s24 = int_to_ptr.vmem [resolvable:$false] %s1284_s24 }
  0x1b   : > { %569 = vperm.xlu1 %1247, %v552_v4   ;;  %1248 = vset.pattern.permute.xlu0 %v1346_v6  ;;  %v282_v21 = vld [vmem:[%s279_s10] sm:$0xf]  ;;  %p1283_p13 = pneg %p1282_p12  ;;  %s1286_s25 = scalar_lea.vmem %s1285_s24, 64 }
  0x1c   : > { %585 = vperm.xlu0 %1248, %v552_v4   ;;  %v293_v22 = vrot.slane %v282_v21, %v1474_v17  ;;  %v297_v23 = vrot.slane %v282_v21, %v1477_v18  ;;  %v317_v24 = vrot.slane %v282_v21, %v1480_v19  ;;  %v321_v25 = vrot.slane %v282_v21, %v1483_v20  ;;  %p1287_p0 = scmp.lt.s32.totalorder %s1711_s18, %s1285_s24  ;;  %p1288_p1 = scmp.lt.s32.totalorder %s1286_s25, %s1280_s23 }
  0x1e   : > { %v303_v27 = vrot.slane %v293_v22, %v1474_v17  ;;  %v307_v28 = vrot.slane %v297_v23, %v1474_v17  ;;  %v327_v29 = vrot.slane %v317_v24, %v1480_v19  ;;  %v331_v30 = vrot.slane %v321_v25, %v1480_v19  ;;  %p1289_p2 = por %p1288_p1, %p1287_p0 }
  0x1f   : > { %1249 = vset.pattern.permute.xlu1 %v1347_v7 }
  0x20   : > { %601 = vperm.xlu1 %1249, %v552_v4   ;;  %1251 = vset.pattern.permute.xlu0 %v1348_v8  ;;  %p1290_p3 = pnand %p1289_p2, %p1283_p13 }
  0x21   : > { %633 = vperm.xlu0 %1251, %v552_v4  }
  0x24   : > { %1250 = vset.pattern.permute.xlu1 %v1349_v10 }
  0x25   : > { %617 = vperm.xlu1 %1250, %v552_v4   ;;  %1254 = vset.pattern.permute.xlu0 %v1344_v3 }
  0x26   : > { %683 = vperm.xlu0 %1254, %v680_v9  }
  0x29   : > { %1252 = vset.pattern.permute.xlu1 %v1350_v11 }
  0x2a   : > { %649 = vperm.xlu1 %1252, %v552_v4   ;;  %1257 = vset.pattern.permute.xlu0 %v1346_v6 }
  0x2b   : > { %927 = vperm.xlu0 %1257, %v896_v13  }
  0x2e   : > { %1253 = vset.pattern.permute.xlu1 %v1351_v12 }
  0x2f   : > { %665 = vperm.xlu1 %1253, %v552_v4   ;;  %1260 = vset.pattern.permute.xlu0 %v1348_v8 }
  0x30   : > { %981 = vperm.xlu0 %1260, %v896_v13  }
  0x33   : > { %1255 = vset.pattern.permute.xlu1 %v1345_v5  ;;  %v1355_v5 = vmov 2102212464  }
  0x34   : > { %909 = vperm.xlu1 %1255, %v896_v13   ;;  %1263 = vset.pattern.permute.xlu0 %v1344_v3 }
  0x35   : > { %1037 = vperm.xlu0 %1263, %v1034_v14   ;;  %v1357_v14 = vmov 1326507024  }
  0x38   : > { %1256 = vset.pattern.permute.xlu1 %v1344_v3  ;;  %v1354_v3 = vmov 2131351028  }
  0x39   : > { %899 = vperm.xlu1 %1256, %v896_v13  }
  0x3d   : > { %1258 = vset.pattern.permute.xlu1 %v1347_v7  ;;  %v1356_v7 = vmov 920167782  }
  0x3e   : > { %945 = vperm.xlu1 %1258, %v896_v13  }
  0x42   : > { %1259 = vset.pattern.permute.xlu1 %v1349_v10 }
  0x43   : > { %963 = vperm.xlu1 %1259, %v896_v13  }
  0x47   : > { %1261 = vset.pattern.permute.xlu1 %v1350_v11 }
  0x48   : > { %999 = vperm.xlu1 %1261, %v896_v13  }
  0x4c   : > { %1262 = vset.pattern.permute.xlu1 %v1351_v12 }
  0x4d   : > { %1017 = vperm.xlu1 %1262, %v896_v13  }
  0x91   : > { %v287_v26 = vpop.permute.xlu0 %286  ;;  %v340_v38 = vpop.permute.xlu1 %339 }
  0x92   : > { %v308_v32 = vmul.f32 %v303_v27, %v287_v26  ;;  %v309_v33 = vmul.f32 %v307_v28, %v287_v26 }
  0x96   : > { %v312_v31 = vpop.permute.xlu0 %311 }
  0x97   : > { %v332_v34 = vmul.f32 %v327_v29, %v312_v31  ;;  %v333_v35 = vmul.f32 %v331_v30, %v312_v31 }
  0x99   : > { %v334_v36 = vadd.f32 %v332_v34, %v308_v32  ;;  %v335_v37 = vadd.f32 %v333_v35, %v309_v33 }
  0x9b   : > { %v1493_v39 = vadd.f32 %v340_v38, %v334_v36  ;;  %v1495_v40 = vadd.f32 %v340_v38, %v335_v37 }
  0x9d   : > { %v344_v41 = vand.u32 2147483647, %v1493_v39  ;;  %v347_v42 = vand.u32 2139095040, %v1493_v39  ;;  %v451_v43 = vand.u32 2139095040, %v1495_v40  ;;  %v448_v46 = vand.u32 2147483647, %v1495_v40 }
  0x9e   : > { %vm346_vm14 = vcmp.lt.s32.totalorder %v1493_v39, 0 }
  0x9f   : > { %v348_v44 = vshrl.u32 %v347_v42, 23  ;;  %v351_v45 = vand.u32 8388607, %v344_v41  ;;  %v452_v47 = vshrl.u32 %v451_v43, 23  ;;  %v1505_v52 = vand.u32 8388607, %v448_v46 }
  0xa0   : > { %vm345_vm15 = vcmp.le.f32.partialorder %v344_v41, 0.7853982 }
  0xa1   : > { %v1152_v48 = vadd.s32 4294967169, %v348_v44  ;;  %v1156_v49 = vadd.s32 4294967169, %v452_v47  ;;  %v352_v51 = vor.u32 8388608, %v351_v45  ;;  %v456_v59 = vor.u32 8388608, %v1505_v52 }
  0xa3   : > { %v354_v50 = vadd.s32 1, %v1152_v48  ;;  %v458_v53 = vadd.s32 1, %v1156_v49  ;;  %v1507_v58 = vshll.u32 %v352_v51, 8 }
  0xa5   : > { %vm355_vm0 = vcmp.gt.s32.totalorder %v354_v50, 0  ;;  %vm459_vm1 = vcmp.gt.s32.totalorder %v458_v53, 0 }
  0xa6   : > { %v356_v54 = vsel %vm355_vm0, %v354_v50, 0  ;;  %v460_v57 = vsel %vm459_vm1, %v458_v53, 0  ;;  %vm450_vm0 = vcmp.lt.s32.totalorder %v1495_v40, 0  ;;  %vm449_vm1 = vcmp.le.f32.partialorder %v448_v46, 0.7853982 }
  0xa7   : > { %v357_v55 = vshrl.u32 %v356_v54, 5  ;;  %v358_v56 = vand.u32 31, %v356_v54  ;;  %v1511_v63 = vshrl.u32 %v460_v57, 5  ;;  %v462_v0 = vand.u32 31, %v460_v57 }
  0xa9   : > { %v359_v60 = vsub.s32 32, %v358_v56  ;;  %v361_v62 = vshll.u32 %v1352_v61, %v358_v56  ;;  %v364_v2 = vshll.u32 %v1353_v1, %v358_v56  ;;  %v367_v4 = vshll.u32 %v1354_v3, %v358_v56 }
  0xaa   : > { %v370_v6 = vshll.u32 %v1355_v5, %v358_v56  ;;  %v373_v8 = vshll.u32 %v1356_v7, %v358_v56  ;;  %vm376_vm2 = vcmp.lt.s32.totalorder %v357_v55, 1  ;;  %vm377_vm3 = vcmp.lt.s32.totalorder %v357_v55, 2 }
  0xab   : > { %v362_v9 = vshrl.u32 %v1353_v1, %v359_v60  ;;  %v365_v10 = vshrl.u32 %v1354_v3, %v359_v60  ;;  %v368_v11 = vshrl.u32 %v1355_v5, %v359_v60  ;;  %v360_v12 = vshrl.u32 %v1352_v61, %v359_v60 }
  0xac   : > { %v371_v13 = vshrl.u32 %v1356_v7, %v359_v60  ;;  %v374_v21 = vshrl.u32 %v1357_v14, %v359_v60  ;;  %v463_v25 = vsub.s32 32, %v462_v0  ;;  %vm378_vm4 = vcmp.lt.s32.totalorder %v357_v55, 3 }
  0xad   : > { %v363_v22 = vor.u32 %v362_v9, %v361_v62  ;;  %v366_v23 = vor.u32 %v365_v10, %v364_v2  ;;  %v369_v24 = vor.u32 %v368_v11, %v367_v4  ;;  %vm379_vm5 = vcmp.lt.s32.totalorder %v357_v55, 4 }
  0xae   : > { %v372_v26 = vor.u32 %v371_v13, %v370_v6  ;;  %v375_v27 = vor.u32 %v374_v21, %v373_v8  ;;  %v465_v35 = vshll.u32 %v1352_v61, %v462_v0  ;;  %v466_v38 = vshrl.u32 %v1353_v1, %v463_v25 }
  0xaf   : > { %v380_v28 = vsel %vm376_vm2, %v360_v12, %v363_v22  ;;  %v381_v29 = vsel %vm379_vm5, %v369_v24, 2102212464  ;;  %v384_v30 = vsel %vm376_vm2, %v363_v22, %v366_v23  ;;  %v388_v31 = vsel %vm376_vm2, %v366_v23, %v369_v24 }
  0xb0   : > { %v382_v32 = vsel %vm378_vm4, %v366_v23, %v381_v29  ;;  %v385_v33 = vsel %vm379_vm5, %v372_v26, 920167782  ;;  %v389_v34 = vsel %vm379_vm5, %v375_v27, 1326507024  ;;  %v468_v42 = vshll.u32 %v1353_v1, %v462_v0 }
  0xb1   : > { %v386_v36 = vsel %vm378_vm4, %v369_v24, %v385_v33  ;;  %v390_v37 = vsel %vm378_vm4, %v372_v26, %v389_v34  ;;  %v383_v43 = vsel %vm377_vm3, %v380_v28, %v382_v32  ;;  %v469_v47 = vshrl.u32 %v1354_v3, %v463_v25 }
  0xb2   : > { %v387_v44 = vsel %vm377_vm3, %v384_v30, %v386_v36  ;;  %v391_v45 = vsel %vm377_vm3, %v388_v31, %v390_v37  ;;  %v467_v52 = vor.u32 %v466_v38, %v465_v35  ;;  %v471_v54 = vshll.u32 %v1354_v3, %v462_v0 }
  0xb3   : > { %v1534_v48 = vmul.u32.u64.low %v1507_v58, %v391_v45  ;;  %v1535_v49 = vmul.u32.u64.high %v1507_v58, %v391_v45, %v1534_v48  ;;  %v1538_v50 = vmul.u32.u64.low %v1507_v58, %v387_v44  ;;  %v1539_v51 = vmul.u32.u64.high %v1507_v58, %v387_v44, %v1538_v50 }
  0xb4   : > { %v470_v53 = vor.u32 %v469_v47, %v468_v42  ;;  %v472_v56 = vshrl.u32 %v1355_v5, %v463_v25  ;;  %v474_v57 = vshll.u32 %v1355_v5, %v462_v0  ;;  %v475_v55 = vshrl.u32 %v1356_v7, %v463_v25 }
  0xb5   : > { %v478_v60 = vshrl.u32 %v1357_v14, %v463_v25  ;;  %v496_v62 = vshll.u32 %v456_v59, 8  ;;  %v399_v2 = vmul.u32 %v1507_v58, %v383_v43  ;;  %v464_v4 = vshrl.u32 %v1352_v61, %v463_v25 }
  0xb6   : > { %v473_v6 = vor.u32 %v472_v56, %v471_v54  ;;  %v477_v8 = vshll.u32 %v1356_v7, %v462_v0  ;;  %vm401_vm6 = vc.u32 %v1535_v49, %v1538_v50  ;;  %v402_v9 = vadd.s32 1, %v1539_v51 }
  0xb7   : > { %v476_v10 = vor.u32 %v475_v55, %v474_v57  ;;  %vm480_vm7 = vcmp.lt.s32.totalorder %v1511_v63, 1  ;;  %vm482_vm8 = vcmp.lt.s32.totalorder %v1511_v63, 3  ;;  %vm483_vm9 = vcmp.lt.s32.totalorder %v1511_v63, 4 }
  0xb8   : > { %v479_v11 = vor.u32 %v478_v60, %v477_v8  ;;  %v488_v59 = vsel %vm480_vm7, %v467_v52, %v470_v53  ;;  %v403_v58 = vsel %vm401_vm6, %v402_v9, %v1539_v51  ;;  %v485_v12 = vsel %vm483_vm9, %v473_v6, 2102212464 }
  0xb9   : > { %v489_v13 = vsel %vm483_vm9, %v476_v10, 920167782  ;;  %v492_v21 = vsel %vm480_vm7, %v470_v53, %v473_v6  ;;  %v404_v22 = vadd.s32 %v403_v58, %v399_v2  ;;  %vm481_vm10 = vcmp.lt.s32.totalorder %v1511_v63, 2 }
  0xba   : > { %v490_v0 = vsel %vm482_vm8, %v473_v6, %v489_v13  ;;  %v493_v23 = vsel %vm483_vm9, %v479_v11, 1326507024  ;;  %v484_v24 = vsel %vm480_vm7, %v464_v4, %v467_v52  ;;  %v486_v25 = vsel %vm482_vm8, %v470_v53, %v485_v12 }
  0xbb   : > { %v491_v26 = vsel %vm481_vm10, %v488_v59, %v490_v0  ;;  %v494_v27 = vsel %vm482_vm8, %v476_v10, %v493_v23  ;;  %v405_v28 = vadd.s32 536870912, %v404_v22  ;;  %v487_v35 = vsel %vm481_vm10, %v484_v24, %v486_v25 }
  0xbc   : > { %v495_v29 = vsel %vm481_vm10, %v492_v21, %v494_v27  ;;  %v1556_v30 = vmul.u32.u64.low %v496_v62, %v491_v26  ;;  %v1557_v31 = vmul.u32.u64.high %v496_v62, %v491_v26, %v1556_v30  ;;  %v503_v63 = vmul.u32 %v496_v62, %v487_v35 }
  0xbd   : > { %v1559_v32 = vmul.u32.u64.low %v496_v62, %v495_v29  ;;  %v1560_v33 = vmul.u32.u64.high %v496_v62, %v495_v29, %v1559_v32  ;;  %v406_v34 = vshrl.u32 %v405_v28, 30  ;;  %v400_v55 = vadd.s32 %v1538_v50, %v1535_v49 }
  0xbe   : > { %v506_v37 = vadd.s32 1, %v1557_v31  ;;  %vm436_vm5 = vweird.f32 %v1493_v39  ;;  %vm540_vm9 = vweird.f32 %v1495_v40 }
  0xbf   : > { %v407_v36 = vshll.u32 %v406_v34, 30  ;;  %vm505_vm11 = vc.u32 %v1560_v33, %v1556_v30  ;;  %v430_v50 = vsub.s32 4, %v406_v34 }
  0xc0   : > { %v507_v42 = vsel %vm505_vm11, %v506_v37, %v1557_v31 }
  0xc1   : > { %v408_v38 = vsub.s32 %v404_v22, %v407_v36  ;;  %v508_v43 = vadd.s32 %v507_v42, %v503_v63  ;;  %v504_v22 = vadd.s32 %v1556_v30, %v1560_v33  ;;  %v431_v32 = vsel %vm346_vm14, %v430_v50, %v406_v34  ;;  %v1571_v33 = vpop.permute.xlu1 %555 }
  0xc2   : > { %v433_v36 = vsel %vm345_vm15, 0, %v431_v32 }
  0xc3   : > { %v410_v44 = vsub.s32 0, %v408_v38  ;;  %v509_v45 = vadd.s32 536870912, %v508_v43 }
  0xc5   : > { %v1153_v47 = vmin.u32 %v410_v44, %v408_v38  ;;  %v510_v48 = vshrl.u32 %v509_v45, 30  ;;  %v1573_v44 = vpop.permute.xlu1 %569 }
  0xc7   : > { %v412_v51 = vclz %v1153_v47  ;;  %v511_v52 = vshll.u32 %v510_v48, 30 }
  0xc9   : > { %v1154_v53 = vadd.s32 4294967294, %v412_v51  ;;  %v512_v54 = vsub.s32 %v508_v43, %v511_v52  ;;  %v437_v43 = vadd.s32 3, %v433_v36 }
  0xcb   : > { %vm1155_vm12 = vcmp.lt.s32.totalorder %v1154_v53, 0  ;;  %v514_v57 = vsub.s32 0, %v512_v54  ;;  %v438_v47 = vand.u32 3, %v437_v43 }
  0xcc   : > { %v415_v56 = vsel %vm1155_vm12, 0, %v1154_v53 }
  0xcd   : > { %v416_v60 = vsub.s32 32, %v415_v56  ;;  %v420_v62 = vsub.s32 4294967266, %v415_v56  ;;  %v1157_v2 = vmin.u32 %v514_v57, %v512_v54  ;;  %v417_v4 = vshll.u32 %v408_v38, %v415_v56 }
  0xce   : > { %v534_v38 = vsub.s32 4, %v510_v48  ;;  %vm443_vm2 = vcmp.eq.s32.totalorder %v438_v47, 2  ;;  %vm440_vm3 = vcmp.eq.s32.totalorder %v438_v47, 0  ;;  %vm439_vm4 = vcmp.lt.s32.totalorder %v438_v47, 2 }
  0xcf   : > { %v418_v6 = vshrl.u32 %v400_v55, %v416_v60  ;;  %v421_v8 = vadd.s32 127, %v420_v62  ;;  %v516_v9 = vclz %v1157_v2 }
  0xd0   : > { %v535_v45 = vsel %vm450_vm0, %v534_v38, %v510_v48 }
  0xd1   : > { %v419_v10 = vor.u32 %v418_v6, %v417_v4  ;;  %v422_v11 = vshll.u32 %v421_v8, 23  ;;  %v1158_v59 = vadd.s32 4294967294, %v516_v9  ;;  %v537_v52 = vsel %vm449_vm1, 0, %v535_v45 }
  0xd2   : > { %v541_v60 = vadd.s32 3, %v537_v52 }
  0xd3   : > { %v423_v58 = vor.u32 4788187, %v422_v11  ;;  %vm1159_vm13 = vcmp.lt.s32.totalorder %v1158_v59, 0  ;;  %v426_v13 = vcvt.s32.f32 %v419_v10  ;;  %v622_v10 = vsub.s32 4, %v1468_v16 }
  0xd4   : > { %v519_v21 = vsel %vm1159_vm13, 0, %v1158_v59  ;;  %v542_v4 = vand.u32 3, %v541_v60 }
  0xd5   : > { %v424_v12 = vand.u32 2147483647, %v423_v58  ;;  %v520_v0 = vsub.s32 32, %v519_v21  ;;  %v524_v23 = vsub.s32 4294967266, %v519_v21  ;;  %v521_v24 = vshll.u32 %v512_v54, %v519_v21  ;;  %v1579_v54 = vpop.permute.xlu1 %601 }
  0xd6   : > { %vm547_vm6 = vcmp.eq.s32.totalorder %v542_v4, 2  ;;  %vm544_vm7 = vcmp.eq.s32.totalorder %v542_v4, 0  ;;  %vm543_vm8 = vcmp.lt.s32.totalorder %v542_v4, 2 }
  0xd7   : > { %v427_v49 = vmul.f32 %v426_v13, %v424_v12  ;;  %v522_v25 = vshrl.u32 %v504_v22, %v520_v0  ;;  %v525_v26 = vadd.s32 127, %v524_v23  ;;  %v654_v0 = vsub.s32 6, %v1468_v16 }
  0xd8   : > { %v638_v23 = vsub.s32 5, %v1468_v16 }
  0xd9   : > { %v428_v27 = vxor.u32 2147483648, %v427_v49  ;;  %v523_v28 = vor.u32 %v522_v25, %v521_v24  ;;  %v526_v29 = vshll.u32 %v525_v26, 23  ;;  %v618_v6 = vpop.permute.xlu1 %617 }
  0xdb   : > { %v429_v31 = vsel %vm346_vm14, %v428_v27, %v427_v49  ;;  %v527_v30 = vor.u32 4788187, %v526_v29  ;;  %v530_v63 = vcvt.s32.f32 %v523_v28  ;;  %v670_v28 = vsub.s32 7, %v1468_v16 }
  0xdc   : > { %v432_v35 = vsel %vm345_vm15, %v1493_v39, %v429_v31  ;;  %v586_v39 = vpop.permute.xlu0 %585 }
  0xdd   : > { %1264 = vcosq.f32 %v432_v35  ;;  %v528_v37 = vand.u32 2147483647, %v527_v30  ;;  %v650_v27 = vpop.permute.xlu1 %649 }
  0xde   : > { %1266 = vsinq.f32 %v432_v35 }
  0xdf   : > { %v531_v42 = vmul.f32 %v530_v63, %v528_v37 }
  0xe1   : > { %v532_v41 = vxor.u32 2147483648, %v531_v42 }
  0xe3   : > { %v533_v34 = vsel %vm450_vm0, %v532_v41, %v531_v42  ;;  %v634_v42 = vpop.permute.xlu0 %633 }
  0xe4   : > { %v536_v51 = vsel %vm449_vm1, %v1495_v40, %v533_v34 }
  0xe5   : > { %1268 = vcosq.f32 %v536_v51 }
  0xe6   : > { %1270 = vsinq.f32 %v536_v51 }
  0xe7   : > { %v1265_v53 = vpop.eup %1264 }
  0xe8   : > { %v1267_v56 = vpop.eup %1266  ;;  %v444_v57 = vxor.u32 2147483648, %v1265_v53 }
  0xe9   : > { %v441_v55 = vxor.u32 2147483648, %v1267_v56 }
  0xea   : > { %v445_v48 = vsel %vm443_vm2, %v444_v57, %v1267_v56 }
  0xeb   : > { %v442_v62 = vsel %vm440_vm3, %v1265_v53, %v441_v55  ;;  %v666_v53 = vpop.permute.xlu1 %665 }
  0xec   : > { %v446_v46 = vsel %vm439_vm4, %v442_v62, %v445_v48 }
  0xed   : > { %v447_v2 = vsel %vm436_vm5, nan, %v446_v46 }
  0xee   : > { %v561_v8 = vrot.slane %v447_v2, %v1474_v17  ;;  %v575_v9 = vrot.slane %v447_v2, %v1480_v19  ;;  %v591_v11 = vrot.slane %v447_v2, %v1477_v18  ;;  %v607_v13 = vrot.slane %v447_v2, %v1483_v20 }
  0xef   : > { %v1269_v59 = vpop.eup %1268  ;;  %v623_v24 = vrot.slane %v447_v2, %v622_v10  ;;  %v639_v30 = vrot.slane %v447_v2, %v638_v23  ;;  %v655_v63 = vrot.slane %v447_v2, %v654_v0  ;;  %v671_v34 = vrot.slane %v447_v2, %v670_v28 }
  0xf0   : > { %v566_v58 = vmul.f32 %v561_v8, %v1571_v33  ;;  %v580_v12 = vmul.f32 %v575_v9, %v1573_v44  ;;  %v1271_v21 = vpop.eup %1270  ;;  %v548_v22 = vxor.u32 2147483648, %v1269_v59  ;;  %v596_v25 = vmul.f32 %v591_v11, %v586_v39  ;;  %v684_v8 = vpop.permute.xlu0 %683 }
  0xf1   : > { %v545_v49 = vxor.u32 2147483648, %v1271_v21  ;;  %v612_v31 = vmul.f32 %v607_v13, %v1579_v54  ;;  %v628_v37 = vmul.f32 %v623_v24, %v618_v6  ;;  %v644_v56 = vmul.f32 %v639_v30, %v634_v42 }
  0xf2   : > { %v582_v50 = vadd.f32 %v580_v12, %v566_v58  ;;  %v549_v26 = vsel %vm547_vm6, %v548_v22, %v1271_v21  ;;  %v660_v57 = vmul.f32 %v655_v63, %v650_v27  ;;  %v676_v46 = vmul.f32 %v671_v34, %v666_v53 }
  0xf3   : > { %v546_v29 = vsel %vm544_vm7, %v1269_v59, %v545_v49 }
  0xf4   : > { %v598_v32 = vadd.f32 %v596_v25, %v582_v50  ;;  %v550_v35 = vsel %vm543_vm8, %v546_v29, %v549_v26 }
  0xf5   : > { %v551_v36 = vsel %vm540_vm9, nan, %v550_v35 }
  0xf6   : > { %v614_v38 = vadd.f32 %v612_v31, %v598_v32  ;;  %v565_v43 = vrot.slane %v551_v36, %v1474_v17  ;;  %v579_v41 = vrot.slane %v551_v36, %v1480_v19  ;;  %v595_v45 = vrot.slane %v551_v36, %v1477_v18 }
  0xf7   : > { %v611_v40 = vrot.slane %v551_v36, %v1483_v20  ;;  %v627_v60 = vrot.slane %v551_v36, %v622_v10  ;;  %v643_v18 = vrot.slane %v551_v36, %v638_v23  ;;  %v675_v59 = vrot.slane %v551_v36, %v670_v28 }
  0xf8   : > { %v630_v47 = vadd.f32 %v628_v37, %v614_v38  ;;  %v567_v51 = vmul.f32 %v565_v43, %v1571_v33  ;;  %v581_v52 = vmul.f32 %v579_v41, %v1573_v44  ;;  %v597_v48 = vmul.f32 %v595_v45, %v586_v39 }
  0xf9   : > { %v613_v19 = vmul.f32 %v611_v40, %v1579_v54  ;;  %v629_v9 = vmul.f32 %v627_v60, %v618_v6  ;;  %v659_v33 = vrot.slane %v551_v36, %v654_v0  ;;  %v645_v58 = vmul.f32 %v643_v18, %v634_v42 }
  0xfa   : > { %v583_v55 = vadd.f32 %v581_v52, %v567_v51  ;;  %v646_v62 = vadd.f32 %v644_v56, %v630_v47  ;;  %v677_v54 = vmul.f32 %v675_v59, %v666_v53 }
  0xfb   : > { %v661_v13 = vmul.f32 %v659_v33, %v650_v27 }
  0xfc   : > { %v599_v4 = vadd.f32 %v597_v48, %v583_v55  ;;  %v662_v2 = vadd.f32 %v660_v57, %v646_v62 }
  0xfe   : > { %v615_v11 = vadd.f32 %v613_v19, %v599_v4  ;;  %v678_v44 = vadd.f32 %v676_v46, %v662_v2 }
 0x100   : > { %v631_v20 = vadd.f32 %v629_v9, %v615_v11  ;;  %v1601_v12 = vadd.f32 %v684_v8, %v678_v44 }
 0x102   : > { %v647_v10 = vadd.f32 %v645_v58, %v631_v20  ;;  %v688_v39 = vand.u32 2147483647, %v1601_v12  ;;  %v691_v21 = vand.u32 2139095040, %v1601_v12  ;;  %vm690_vm7 = vcmp.lt.s32.totalorder %v1601_v12, 0 }
 0x104   : > { %v663_v22 = vadd.f32 %v661_v13, %v647_v10  ;;  %v692_v23 = vshrl.u32 %v691_v21, 23  ;;  %v695_v6 = vand.u32 8388607, %v688_v39  ;;  %vm1669_vm8 = vcmp.le.f32.partialorder %v688_v39, 0.7853982 }
 0x106   : > { %v679_v49 = vadd.f32 %v677_v54, %v663_v22  ;;  %v1160_v50 = vadd.s32 4294967169, %v692_v23  ;;  %v696_v25 = vor.u32 8388608, %v695_v6 }
 0x108   : > { %v1607_v0 = vadd.f32 %v684_v8, %v679_v49  ;;  %v698_v24 = vadd.s32 1, %v1160_v50  ;;  %v736_v32 = vshll.u32 %v696_v25, 8 }
 0x10a   : > { %vm699_vm10 = vcmp.gt.s32.totalorder %v698_v24, 0  ;;  %v795_v26 = vand.u32 2139095040, %v1607_v0  ;;  %v792_v28 = vand.u32 2147483647, %v1607_v0 }
 0x10b   : > { %v700_v27 = vsel %vm699_vm10, %v698_v24, 0 }
 0x10c   : > { %v702_v29 = vand.u32 31, %v700_v27  ;;  %v796_v35 = vshrl.u32 %v795_v26, 23  ;;  %v701_v30 = vshrl.u32 %v700_v27, 5  ;;  %v1615_v63 = vand.u32 8388607, %v792_v28 }
 0x10e   : > { %v703_v31 = vsub.s32 32, %v702_v29  ;;  %v705_v36 = vshll.u32 %v1352_v61, %v702_v29  ;;  %v708_v37 = vshll.u32 %v1353_v1, %v702_v29  ;;  %v711_v43 = vshll.u32 %v1354_v3, %v702_v29 }
 0x10f   : > { %v714_v45 = vshll.u32 %v1355_v5, %v702_v29  ;;  %v717_v47 = vshll.u32 %v1356_v7, %v702_v29  ;;  %v1164_v56 = vadd.s32 4294967169, %v796_v35  ;;  %vm720_vm11 = vcmp.lt.s32.totalorder %v701_v30, 1 }
 0x110   : > { %v706_v38 = vshrl.u32 %v1353_v1, %v703_v31  ;;  %v709_v42 = vshrl.u32 %v1354_v3, %v703_v31  ;;  %v712_v41 = vshrl.u32 %v1355_v5, %v703_v31  ;;  %v715_v34 = vshrl.u32 %v1356_v7, %v703_v31 }
 0x111   : > { %v718_v51 = vshrl.u32 %v1357_v14, %v703_v31  ;;  %vm723_vm12 = vcmp.lt.s32.totalorder %v701_v30, 4  ;;  %v704_v60 = vshrl.u32 %v1352_v61, %v703_v31  ;;  %vm722_vm13 = vcmp.lt.s32.totalorder %v701_v30, 3 }
 0x112   : > { %v707_v52 = vor.u32 %v706_v38, %v705_v36  ;;  %v710_v40 = vor.u32 %v709_v42, %v708_v37  ;;  %v713_v53 = vor.u32 %v712_v41, %v711_v43  ;;  %v716_v57 = vor.u32 %v715_v34, %v714_v45 }
 0x113   : > { %v719_v55 = vor.u32 %v718_v51, %v717_v47  ;;  %v802_v18 = vadd.s32 1, %v1164_v56  ;;  %vm721_vm14 = vcmp.lt.s32.totalorder %v701_v30, 2  ;;  %v800_v23 = vor.u32 8388608, %v1615_v63 }
 0x114   : > { %v725_v48 = vsel %vm723_vm12, %v713_v53, 2102212464  ;;  %v728_v62 = vsel %vm720_vm11, %v707_v52, %v710_v40  ;;  %v732_v46 = vsel %vm720_vm11, %v710_v40, %v713_v53  ;;  %v729_v19 = vsel %vm723_vm12, %v716_v57, 920167782 }
 0x115   : > { %v733_v4 = vsel %vm723_vm12, %v719_v55, 1326507024  ;;  %v724_v2 = vsel %vm720_vm11, %v704_v60, %v707_v52  ;;  %v730_v8 = vsel %vm722_vm13, %v713_v53, %v729_v19  ;;  %v726_v33 = vsel %vm722_vm13, %v710_v40, %v725_v48 }
 0x116   : > { %v734_v9 = vsel %vm722_vm13, %v716_v57, %v733_v4  ;;  %v731_v11 = vsel %vm721_vm14, %v728_v62, %v730_v8  ;;  %vm803_vm15 = vcmp.gt.s32.totalorder %v802_v18, 0  ;;  %v727_v21 = vsel %vm721_vm14, %v724_v2, %v726_v33 }
 0x117   : > { %v735_v44 = vsel %vm721_vm14, %v732_v46, %v734_v9  ;;  %v1629_v58 = vmul.u32.u64.low %v736_v32, %v731_v11  ;;  %v1630_v13 = vmul.u32.u64.high %v736_v32, %v731_v11, %v1629_v58  ;;  %v804_v10 = vsel %vm803_vm15, %v802_v18, 0 }
 0x118   : > { %v1626_v59 = vmul.u32.u64.low %v736_v32, %v735_v44  ;;  %v1627_v20 = vmul.u32.u64.high %v736_v32, %v735_v44, %v1626_v59  ;;  %v806_v54 = vand.u32 31, %v804_v10  ;;  %v743_v50 = vmul.u32 %v736_v32, %v727_v21 }
 0x119   : > { %v746_v22 = vadd.s32 1, %v1630_v13  ;;  %v805_v6 = vshrl.u32 %v804_v10, 5  ;;  %v840_v45 = vshll.u32 %v800_v23, 8  ;;  %vm1682_vm12 = vcmp.le.f32.partialorder %v792_v28, 0.7853982 }
 0x11a   : > { %vm745_vm0 = vc.u32 %v1627_v20, %v1629_v58  ;;  %v807_v49 = vsub.s32 32, %v806_v54  ;;  %v809_v24 = vshll.u32 %v1352_v61, %v806_v54  ;;  %v812_v25 = vshll.u32 %v1353_v1, %v806_v54 }
 0x11b   : > { %v747_v26 = vsel %vm745_vm0, %v746_v22, %v1630_v13  ;;  %v815_v31 = vshll.u32 %v1354_v3, %v806_v54  ;;  %v818_v36 = vshll.u32 %v1355_v5, %v806_v54  ;;  %v821_v38 = vshll.u32 %v1356_v7, %v806_v54 }
 0x11c   : > { %v810_v27 = vshrl.u32 %v1353_v1, %v807_v49  ;;  %v813_v29 = vshrl.u32 %v1354_v3, %v807_v49  ;;  %v748_v35 = vadd.s32 %v747_v26, %v743_v50  ;;  %v816_v30 = vshrl.u32 %v1355_v5, %v807_v49 }
 0x11d   : > { %v819_v32 = vshrl.u32 %v1356_v7, %v807_v49  ;;  %v822_v42 = vshrl.u32 %v1357_v14, %v807_v49  ;;  %vm824_vm1 = vcmp.lt.s32.totalorder %v805_v6, 1  ;;  %vm825_vm2 = vcmp.lt.s32.totalorder %v805_v6, 2 }
 0x11e   : > { %v811_v37 = vor.u32 %v810_v27, %v809_v24  ;;  %v814_v63 = vor.u32 %v813_v29, %v812_v25  ;;  %v749_v43 = vadd.s32 536870912, %v748_v35  ;;  %v817_v41 = vor.u32 %v816_v30, %v815_v31 }
 0x11f   : > { %v820_v1 = vor.u32 %v819_v32, %v818_v36  ;;  %v823_v34 = vor.u32 %v822_v42, %v821_v38  ;;  %vm827_vm3 = vcmp.lt.s32.totalorder %v805_v6, 4  ;;  %vm826_vm4 = vcmp.lt.s32.totalorder %v805_v6, 3 }
 0x120   : > { %v750_v3 = vshrl.u32 %v749_v43, 30  ;;  %v832_v5 = vsel %vm824_vm1, %v811_v37, %v814_v63  ;;  %v829_v51 = vsel %vm827_vm3, %v817_v41, 2102212464  ;;  %v836_v40 = vsel %vm824_vm1, %v814_v63, %v817_v41 }
 0x121   : > { %v833_v47 = vsel %vm827_vm3, %v820_v1, 920167782  ;;  %v837_v7 = vsel %vm827_vm3, %v823_v34, 1326507024  ;;  %v808_v14 = vshrl.u32 %v1352_v61, %v807_v49  ;;  %v830_v46 = vsel %vm826_vm4, %v814_v63, %v829_v51  ;;  %v910_v34 = vpop.permute.xlu1 %909 }
 0x122   : > { %v834_v52 = vsel %vm826_vm4, %v817_v41, %v833_v47  ;;  %v751_v53 = vshll.u32 %v750_v3, 30  ;;  %v838_v57 = vsel %vm826_vm4, %v820_v1, %v837_v7  ;;  %v744_v54 = vadd.s32 %v1629_v58, %v1627_v20 }
 0x123   : > { %v835_v56 = vsel %vm825_vm2, %v832_v5, %v834_v52  ;;  %v828_v62 = vsel %vm824_vm1, %v808_v14, %v811_v37  ;;  %v839_v19 = vsel %vm825_vm2, %v836_v40, %v838_v57  ;;  %v774_v63 = vsub.s32 4, %v750_v3 }
 0x124   : > { %v1652_v55 = vmul.u32.u64.low %v840_v45, %v835_v56  ;;  %v1653_v60 = vmul.u32.u64.high %v840_v45, %v835_v56, %v1652_v55  ;;  %v752_v48 = vsub.s32 %v748_v35, %v751_v53  ;;  %v831_v8 = vsel %vm825_vm2, %v828_v62, %v830_v46 }
 0x125   : > { %v1657_v4 = vmul.u32.u64.low %v840_v45, %v839_v19  ;;  %v1658_v18 = vmul.u32.u64.high %v840_v45, %v839_v19, %v1657_v4  ;;  %v847_v11 = vmul.u32 %v840_v45, %v831_v8  ;;  %v775_v41 = vsel %vm690_vm7, %v774_v63, %v750_v3  ;;  %v900_v56 = vpop.permute.xlu1 %899  ;;  %v928_v8 = vpop.permute.xlu0 %927 }
 0x126   : > { %v754_v2 = vsub.s32 0, %v752_v48  ;;  %v850_v61 = vadd.s32 1, %v1653_v60  ;;  %v777_v39 = vsel %vm1669_vm8, 0, %v775_v41  ;;  %vm794_vm13 = vcmp.lt.s32.totalorder %v1607_v0, 0 }
 0x127   : > { %vm849_vm5 = vc.u32 %v1658_v18, %v1652_v55  ;;  %v848_v5 = vadd.s32 %v1652_v55, %v1658_v18  ;;  %v781_v3 = vadd.s32 3, %v777_v39  ;;  %vm780_vm15 = vweird.f32 %v1601_v12 }
 0x128   : > { %v1161_v9 = vmin.u32 %v754_v2, %v752_v48  ;;  %v851_v44 = vsel %vm849_vm5, %v850_v61, %v1653_v60  ;;  %vm884_vm3 = vweird.f32 %v1607_v0  ;;  %vm1068_vm4 = vcmp.lt.s32.totalorder %v290_v15, 256 }
 0x129   : > { %v852_v13 = vadd.s32 %v851_v44, %v847_v11  ;;  %v782_v60 = vand.u32 3, %v781_v3  ;;  %v946_v2 = vpop.permute.xlu1 %945 }
 0x12a   : > { %v756_v33 = vclz %v1161_v9 }
 0x12b   : > { %v853_v10 = vadd.s32 536870912, %v852_v13  ;;  %vm787_vm10 = vcmp.eq.s32.totalorder %v782_v60, 2  ;;  %vm784_vm11 = vcmp.eq.s32.totalorder %v782_v60, 0  ;;  %vm783_vm14 = vcmp.lt.s32.totalorder %v782_v60, 2 }
 0x12c   : > { %v1162_v59 = vadd.s32 4294967294, %v756_v33  ;;  %v933_v33 = vrot.slane %v928_v8, %v1474_v17 }
 0x12d   : > { %v854_v49 = vshrl.u32 %v853_v10, 30 }
 0x12e   : > { %vm1163_vm6 = vcmp.lt.s32.totalorder %v1162_v59, 0 }
 0x12f   : > { %v759_v21 = vsel %vm1163_vm6, 0, %v1162_v59  ;;  %v855_v25 = vshll.u32 %v854_v49, 30  ;;  %v878_v55 = vsub.s32 4, %v854_v49 }
 0x130   : > { %v760_v22 = vsub.s32 32, %v759_v21  ;;  %v764_v23 = vsub.s32 4294967266, %v759_v21  ;;  %v761_v50 = vshll.u32 %v752_v48, %v759_v21 }
 0x131   : > { %v856_v29 = vsub.s32 %v852_v13, %v855_v25  ;;  %v879_v10 = vsel %vm794_vm13, %v878_v55, %v854_v49 }
 0x132   : > { %v762_v6 = vshrl.u32 %v744_v54, %v760_v22  ;;  %v765_v24 = vadd.s32 127, %v764_v23  ;;  %v915_v22 = vrot.slane %v910_v34, %v1474_v17  ;;  %v881_v28 = vsel %vm1682_vm12, 0, %v879_v10 }
 0x133   : > { %v858_v35 = vsub.s32 0, %v856_v29 }
 0x134   : > { %v763_v26 = vor.u32 %v762_v6, %v761_v50  ;;  %v766_v27 = vshll.u32 %v765_v24, 23  ;;  %v905_v6 = vrot.slane %v900_v56, %v1474_v17  ;;  %v964_v24 = vpop.permute.xlu1 %963 }
 0x135   : > { %v1165_v32 = vmin.u32 %v858_v35, %v856_v29  ;;  %v969_v35 = vrot.slane %v964_v24, %v1474_v17  ;;  %v1358_v24 = vmov 1966171168  }
 0x136   : > { %v767_v31 = vor.u32 4788187, %v766_v27  ;;  %v770_v36 = vcvt.s32.f32 %v763_v26  ;;  %v951_v26 = vrot.slane %v946_v2, %v1474_v17  ;;  %v885_v27 = vadd.s32 3, %v881_v28 }
 0x137   : > { %v860_v38 = vclz %v1165_v32 }
 0x138   : > { %v768_v30 = vand.u32 2147483647, %v767_v31  ;;  %v1000_v32 = vpop.permute.xlu1 %999  ;;  %v886_v63 = vand.u32 3, %v885_v27 }
 0x139   : > { %v1166_v20 = vadd.s32 4294967294, %v860_v38  ;;  %v1005_v34 = vrot.slane %v1000_v32, %v1474_v17 }
 0x13a   : > { %v771_v37 = vmul.f32 %v770_v36, %v768_v30  ;;  %v982_v36 = vpop.permute.xlu0 %981  ;;  %vm891_vm0 = vcmp.eq.s32.totalorder %v886_v63, 2  ;;  %vm888_vm1 = vcmp.eq.s32.totalorder %v886_v63, 0  ;;  %vm887_vm2 = vcmp.lt.s32.totalorder %v886_v63, 2 }
 0x13b   : > { %vm1167_vm9 = vcmp.lt.s32.totalorder %v1166_v20, 0 }
 0x13c   : > { %v772_v42 = vxor.u32 2147483648, %v771_v37  ;;  %v863_v45 = vsel %vm1167_vm9, 0, %v1166_v20  ;;  %v987_v20 = vrot.slane %v982_v36, %v1474_v17 }
 0x13d   : > { %v864_v47 = vsub.s32 32, %v863_v45  ;;  %v868_v51 = vsub.s32 4294967266, %v863_v45  ;;  %v865_v52 = vshll.u32 %v856_v29, %v863_v45 }
 0x13e   : > { %v773_v43 = vsel %vm690_vm7, %v772_v42, %v771_v37 }
 0x13f   : > { %v776_v1 = vsel %vm1669_vm8, %v1601_v12, %v773_v43  ;;  %v866_v40 = vshrl.u32 %v848_v5, %v864_v47  ;;  %v869_v7 = vadd.s32 127, %v868_v51  ;;  %v1018_v51 = vpop.permute.xlu1 %1017 }
 0x140   : > { %1272 = vcosq.f32 %v776_v1 }
 0x141   : > { %1274 = vsinq.f32 %v776_v1  ;;  %v867_v53 = vor.u32 %v866_v40, %v865_v52  ;;  %v870_v14 = vshll.u32 %v869_v7, 23 }
 0x143   : > { %v871_v57 = vor.u32 4788187, %v870_v14  ;;  %v874_v62 = vcvt.s32.f32 %v867_v53  ;;  %v1023_v53 = vrot.slane %v1018_v51, %v1474_v17 }
 0x145   : > { %v872_v48 = vand.u32 2147483647, %v871_v57 }
 0x147   : > { %v875_v19 = vmul.f32 %v874_v62, %v872_v48 }
 0x149   : > { %v876_v9 = vxor.u32 2147483648, %v875_v19 }
 0x14a   : > { %v1273_v46 = vpop.eup %1272 }
 0x14b   : > { %v1275_v4 = vpop.eup %1274  ;;  %v788_v18 = vxor.u32 2147483648, %v1273_v46  ;;  %v877_v13 = vsel %vm794_vm13, %v876_v9, %v875_v19 }
 0x14c   : > { %v785_v61 = vxor.u32 2147483648, %v1275_v4  ;;  %v880_v54 = vsel %vm1682_vm12, %v1607_v0, %v877_v13 }
 0x14d   : > { %v789_v11 = vsel %vm787_vm10, %v788_v18, %v1275_v4  ;;  %1276 = vcosq.f32 %v880_v54 }
 0x14e   : > { %v786_v59 = vsel %vm784_vm11, %v1273_v46, %v785_v61  ;;  %1278 = vsinq.f32 %v880_v54 }
 0x14f   : > { %v790_v21 = vsel %vm783_vm14, %v786_v59, %v789_v11  ;;  %v1038_v11 = vpop.permute.xlu0 %1037 }
 0x150   : > { %v791_v23 = vsel %vm780_vm15, nan, %v790_v21 }
 0x151   : > { %v916_v50 = vmul.f32 %v915_v22, %v791_v23  ;;  %v934_v49 = vmul.f32 %v933_v33, %v791_v23  ;;  %v906_v12 = vmul.f32 %v905_v6, %v791_v23  ;;  %v952_v31 = vmul.f32 %v951_v26, %v791_v23 }
 0x152   : > { %v970_v42 = vmul.f32 %v969_v35, %v791_v23  ;;  %v988_v39 = vmul.f32 %v987_v20, %v791_v23  ;;  %v1006_v56 = vmul.f32 %v1005_v34, %v791_v23  ;;  %v1024_v55 = vmul.f32 %v1023_v53, %v791_v23 }
 0x153   : > { %v920_v25 = vrot.slane %v916_v50, 1  ;;  %v938_v30 = vrot.slane %v934_v49, 2  ;;  %v956_v38 = vrot.slane %v952_v31, 3  ;;  %v1052_v49 = vunpack.c.l.s4 %v1358_v24 }
 0x154   : > { %v974_v47 = vrot.slane %v970_v42, 4  ;;  %v992_v57 = vrot.slane %v988_v39, 5  ;;  %v1010_v2 = vrot.slane %v1006_v56, 6  ;;  %v1028_v21 = vrot.slane %v1024_v55, 7 }
 0x155   : > { %v924_v29 = vadd.f32 %v920_v25, %v906_v12  ;;  %v1053_v27 = vunpack.c.0.s8 %v1052_v49 }
 0x157   : > { %v942_v37 = vadd.f32 %v938_v30, %v924_v29  ;;  %v1277_v58 = vpop.eup %1276 }
 0x158   : > { %v1279_v43 = vpop.eup %1278  ;;  %v892_v41 = vxor.u32 2147483648, %v1277_v58 }
 0x159   : > { %v960_v1 = vadd.f32 %v956_v38, %v942_v37  ;;  %v889_v45 = vxor.u32 2147483648, %v1279_v43 }
 0x15a   : > { %v893_v5 = vsel %vm891_vm0, %v892_v41, %v1279_v43 }
 0x15b   : > { %v890_v52 = vsel %vm888_vm1, %v1277_v58, %v889_v45  ;;  %v978_v7 = vadd.f32 %v974_v47, %v960_v1 }
 0x15c   : > { %v894_v40 = vsel %vm887_vm2, %v890_v52, %v893_v5 }
 0x15d   : > { %v895_v3 = vsel %vm884_vm3, nan, %v894_v40  ;;  %v996_v19 = vadd.f32 %v992_v57, %v978_v7 }
 0x15e   : > { %v917_v14 = vmul.f32 %v915_v22, %v895_v3  ;;  %v935_v60 = vmul.f32 %v933_v33, %v895_v3  ;;  %v907_v62 = vmul.f32 %v905_v6, %v895_v3  ;;  %v953_v46 = vmul.f32 %v951_v26, %v895_v3 }
 0x15f   : > { %v971_v18 = vmul.f32 %v969_v35, %v895_v3  ;;  %v989_v9 = vmul.f32 %v987_v20, %v895_v3  ;;  %v1014_v44 = vadd.f32 %v1010_v2, %v996_v19  ;;  %v1007_v13 = vmul.f32 %v1005_v34, %v895_v3 }
 0x160   : > { %v921_v48 = vrot.slane %v917_v14, 1  ;;  %v939_v8 = vrot.slane %v935_v60, 2  ;;  %v957_v61 = vrot.slane %v953_v46, 3  ;;  %v1043_v33 = vrot.slane %v1038_v11, %v1474_v17 }
 0x161   : > { %v975_v59 = vrot.slane %v971_v18, 4  ;;  %v1025_v54 = vmul.f32 %v1023_v53, %v895_v3  ;;  %v993_v28 = vrot.slane %v989_v9, 5  ;;  %v1032_v23 = vadd.f32 %v1028_v21, %v1014_v44 }
 0x162   : > { %v925_v4 = vadd.f32 %v921_v48, %v907_v62  ;;  %v1011_v50 = vrot.slane %v1007_v13, 6  ;;  %v1056_v17 = vsub.s32 %v1053_v27, %v1468_v16 }
 0x163   : > { %v1029_v25 = vrot.slane %v1025_v54, 7  ;;  %v1044_v26 = vadd.f32 %v1043_v33, %v1032_v23 }
 0x164   : > { %v943_v0 = vadd.f32 %v939_v8, %v925_v4 }
 0x165   : > { %v1046_v35 = vadd.f32 0.5, %v1044_v26 }
 0x166   : > { %v961_v10 = vadd.f32 %v957_v61, %v943_v0 }
 0x168   : > { %v979_v22 = vadd.f32 %v975_v59, %v961_v10 }
 0x16a   : > { %v997_v6 = vadd.f32 %v993_v28, %v979_v22 }
 0x16c   : > { %v1015_v12 = vadd.f32 %v1011_v50, %v997_v6 }
 0x16e   : > { %v1033_v29 = vadd.f32 %v1029_v25, %v1015_v12 }
 0x170   : > { %v1045_v31 = vadd.f32 %v1043_v33, %v1033_v29 }
 0x172   : > { %v1047_v30 = vadd.f32 0.5, %v1045_v31 }
 0x174   : > { %v1050_v36 = vcombine.low %v1046_v35, %v1047_v30 }
 0x176   : > { %v1057_v32 = vrot.slane %v1050_v36, %v1056_v17 }
 0x178   : > { %v1064_v37 = vrot.slane %v1057_v32, %v1056_v17 }
 0x17a   : > { %1070 = vst.msk [vmem:[%s274_s17] sm:$0x3] %vm1068_vm4, %v1064_v37 }
 0x17b   : > { %1293 = shalt.err (!%p1290_p3)
}
 0x17c   : > { %s1294_s30 = scalar_lea.hbm %s1709_s21, 32  ;;  %s1298_s14 = scalar_lea.hbm %s1758_s7, 64 }
 0x17d   : > { %p1295_p4 = scmp.ne.s32.totalorder %s1709_s21, %s1294_s30  ;;  %p1299_p9 = scmp.lt.u32.totalorder %s1709_s21, %s1758_s7 }
 0x17e   : > { %p1300_p10 = scmp.lt.u32.totalorder %s1298_s14, %s1294_s30  ;;  %p1302_p12 = scmp.lt.u32.totalorder %s1294_s30, %s1709_s21 }
 0x17f   : > { %p1296_p7 = pnand %p1295_p4, %p1441_p5 }
 0x180   : > { %p1301_p11 = por %p1300_p10, %p1299_p9 }
 0x181   : > { %p1297_p8 = pneg %p1296_p7 }
 0x182   : > { %p1303_p13 = por %p1302_p12, %p1301_p11 }
 0x184   : > { %p1304_p0 = pnand %p1303_p13, %p1297_p8 }
 0x186   : > { %1307 = shalt.err (!%p1304_p0)
}
 0x187   : > { %1190 = dma.vmem_to_hbm [thread:$0]  (%p1441_p5), %s1711_s18, 32, %s1709_s21, %s1072_s22  }
 0x188 PF: > { %p1196_p1 = scmp.ge.s32.totalorder %s1342_s29, 2  ;;  %s1098_s17 = sand.u32 1, %s1330_s26  }
 0x189   : > { %s1099_s19 = scalar_lea.sflag [#allocation4], %s1098_s17 }
 0x18a   : > { %p1193_p2 = pnand %p1196_p1, %p1445_p6 }
 0x18c   : > { %1325 = dma.done.wait (!%p1193_p2), %s1099_s19, 32  }
 0x18d   : > { %1327 = vsyncadd (!%p1193_p2), %s1099_s19, 4294967264  ;;  %p19_p3 = scmp.ge.s32.totalorder %s1428_s8, 4   ;;  %s1765_s26 = smov %s1334_s27 }
 0x18e   : > { %s1766_s27 = smov %s1338_s28  ;;  %s1767_s28 = smov %s1439_s11 }
 0x18f   : > { %s1768_s29 = smov %s1428_s8  ;;  %21 = sbr.rel (!%p19_p3) target bundleno = 6 (0x6), region = 83 }
 0x196   :  { %1104 = vsyncpa [#allocation4], 1 }
 0x197   :  { %1106 = vsyncpa [#allocation4 + $0x1], 1 }

</bundles_post_ra>
